<compile_context>
chip_gen: v7x
topology: tpu7x:2x2x1
jax: 0.10.0
libtpu: 0.0.40
codegen_flags: <defaults>
</compile_context>

<pallas_src>
import functools

import jax
import jax.numpy as jnp
from jax.experimental import pallas as pl
from jax.experimental.pallas import tpu as pltpu


def _grad2g_block_kernel(x_ref, out_ref, *, H, W, n_rows, mask_rows,
                         inv_cyy, inv_cxx, inv_cxy):
    """One grid step: partial bending penalty of a (tn, H*W) slab of images."""
    L = H * W
    x = x_ref[...]                       # (tn, L), native dtype (f32 or bf16)
    tn = x.shape[0]

    # Ragged last block: zero rows past the true batch extent (replaces the old
    # wrapper-side jnp.pad, so no extra HBM copy).  Zero rows contribute exactly
    # zero to every squared difference, and rolls never mix rows, so this is
    # exact even though the padded region of the block holds unspecified data.
    if mask_rows:
        valid = n_rows - pl.program_id(0) * tn
        row = jax.lax.broadcasted_iota(jnp.int32, (tn, 1), 0)
        x = jnp.where(row < valid, x, jnp.zeros((), x.dtype))

    # shifted[:, k] = a[:, (k + d) % L]  (jnp.roll semantics -> shift by L - d).
    def fwd(a, d):
        return pltpu.roll(a, L - d, axis=1)

    # All five lane rolls on the native dtype, roll->roll chains only.
    # Flat stride W == step along H, flat stride 1 == step along W.
    x_w = fwd(x, W)        # x[i+1, j  ]
    x_1 = fwd(x, 1)        # x[i,   j+1]
    x_2w = fwd(x_w, W)     # x[i+2, j  ]
    x_2 = fwd(x_1, 1)      # x[i,   j+2]
    x_w1 = fwd(x_w, 1)     # x[i+1, j+1]

    f32 = jnp.float32
    xf, xwf, x1f = x.astype(f32), x_w.astype(f32), x_1.astype(f32)
    ty = xwf - xf
    tx = x1f - xf
    tyy = (x_2w.astype(f32) - xwf) - ty
    txx = (x_2.astype(f32) - x1f) - tx
    txy = (x_w1.astype(f32) - xwf) - tx

    # Row-invariant validity masks at (1, L); broadcast across sublanes so no
    # block-sized int32/bool temporaries are materialized.  k = i*W + j:
    #   tyy valid for i <= H-3  <=> k   < (H-2)*W
    #   txx valid for j <= W-3  <=> col < W-2
    #   txy valid for i <= H-2 and j <= W-2
    k = jax.lax.broadcasted_iota(jnp.int32, (1, L), 1)
    col = (k & (W - 1)) if (W & (W - 1)) == 0 else (k % W)
    m_yy = k < (H - 2) * W
    m_xx = col < (W - 2)
    m_xy = jnp.logical_and(k < (H - 1) * W, col < (W - 1))

    # Single fused, pre-weighted accumulator -> one cross-lane/sublane reduction
    # instead of three.  inv_* are trace-time reciprocals of the *global*
    # element counts, so summing per-block partials reproduces the three means.
    zero = jnp.float32(0.0)
    acc = (jnp.square(jnp.where(m_yy, tyy, zero)) * inv_cyy
           + jnp.square(jnp.where(m_xx, txx, zero)) * inv_cxx
           + jnp.square(jnp.where(m_xy, txy, zero)) * (2.0 * inv_cxy))
    p = jnp.sum(acc)

    # Lane-dense (1, 8, 128) output tile per grid step (unmasked store); the
    # wrapper reads element [g, 0, 0] of each block and sums.
    out_ref[...] = jnp.broadcast_to(p, out_ref.shape).astype(out_ref.dtype)


def grad2g(_, pred, *, max_block_rows=4096):
    """Forward of Grad2g: bending penalty of a 2D spatial transform.

    Args:
      _: ignored (matches the PyTorch signature).
      pred: (B, C, H, W) displacement field (f32 or bf16; cast to f32 in-VMEM).
      max_block_rows: cap on images per grid step (tuning knob).
    Returns:
      scalar float32 penalty.
    """
    B, C, H, W = pred.shape
    if H < 3 or W < 3:
        raise ValueError("Grad2g requires H >= 3 and W >= 3.")
    N = B * C
    L = H * W

    # Lane-dense view: batch*channels on the sublane/grid axis, H*W on lanes.
    # Pure reshape of a contiguous array -> no HBM copy, no padding.
    x = pred.reshape(N, L)

    # Generation-aware block sizing.  The kernel keeps a handful of block-sized
    # f32 temporaries plus the double-buffered native-dtype input, so the f32
    # block is capped well under the scoped-VMEM limit.
    try:
        vmem_cap = int(pltpu.get_tpu_info().vmem_capacity_bytes)
    except Exception:  # unknown chip / query unavailable -> be conservative
        vmem_cap = 0
    if vmem_cap > 64 * 1024 * 1024:
        # v5e / v6e class: 128 MiB physical VMEM.
        f32_block_cap = 4 * 1024 * 1024
        vmem_limit = 64 * 1024 * 1024
    else:
        # v7x (64 MiB physical / 32 MiB default scoped) or unknown.
        f32_block_cap = 2 * 1024 * 1024
        vmem_limit = 32 * 1024 * 1024

    rows_cap = max(8, (f32_block_cap // (L * 4)) // 8 * 8)
    tn = min(int(max_block_rows), rows_cap)
    if N >= 16:
        # Guarantee >= 2 grid steps: both v7x TensorCores get work and the DMA
        # of one block overlaps compute of another on every generation.
        tn = min(tn, pl.cdiv(pl.cdiv(N, 2), 8) * 8)
    if N >= 8:
        tn = max(8, min(tn, pl.cdiv(N, 8) * 8))   # multiple of 8 sublanes
    else:
        tn = N                                    # block dim == full array dim
    G = pl.cdiv(N, tn)
    mask_rows = (N % tn) != 0

    # Global mean divisors, folded into trace-time reciprocals.
    inv_cyy = 1.0 / float(N * (H - 2) * W)
    inv_cxx = 1.0 / float(N * H * (W - 2))
    inv_cxy = 1.0 / float(N * (H - 1) * (W - 1))

    kernel = functools.partial(
        _grad2g_block_kernel,
        H=H, W=W, n_rows=N, mask_rows=mask_rows,
        inv_cyy=inv_cyy, inv_cxx=inv_cxx, inv_cxy=inv_cxy,
    )

    partials = pl.pallas_call(
        kernel,
        out_shape=jax.ShapeDtypeStruct((G, 8, 128), jnp.float32),
        grid=(G,),
        in_specs=[pl.BlockSpec((tn, L), lambda g: (g, 0))],
        out_specs=pl.BlockSpec((1, 8, 128), lambda g: (g, 0, 0)),
        compiler_params=pltpu.CompilerParams(
            # Independent per-block partials -> the grid axis is truly parallel,
            # letting v7x shard grid steps across its two TensorCores.
            dimension_semantics=("parallel",),
            vmem_limit_bytes=vmem_limit,
        ),
    )(x)

    # Tiny final reduction over per-block partial penalties.
    return jnp.sum(partials[:, 0, 0])


def _reference(pred):
    """Pure-JAX reference mirroring the PyTorch module exactly."""
    ty = pred[:, :, 1:, :] - pred[:, :, :-1, :]
    tx = pred[:, :, :, 1:] - pred[:, :, :, :-1]
    tyy = ty[:, :, 1:, :] - ty[:, :, :-1, :]
    txx = tx[:, :, :, 1:] - tx[:, :, :, :-1]
    txy = tx[:, :, 1:, :] - tx[:, :, :-1, :]
    return jnp.mean(tyy ** 2) + jnp.mean(txx ** 2) + 2.0 * jnp.mean(txy ** 2)


if __name__ == "__main__":
    key = jax.random.PRNGKey(0)
    k1, k2, k3 = jax.random.split(key, 3)

    # Small shapes consistent with the module's NCHW input.
    pred = jax.random.normal(k1, (2, 4, 16, 16), dtype=jnp.float32)
    dummy = jax.random.normal(k2, (2, 4, 16, 16), dtype=jnp.float32)  # ignored

    out = grad2g(dummy, pred)
    jax.block_until_ready(out)
    ref = _reference(pred)
    assert jnp.allclose(out, ref, rtol=1e-5, atol=1e-6), (float(out), float(ref))

    # Second check: multi-step grid (G=2) with a ragged last block (N=24,
    # tn=16) -> exercises the parallel grid, the per-block partials, and the
    # in-kernel row masking that replaced jnp.pad.
    pred2 = jax.random.normal(k3, (6, 4, 16, 16), dtype=jnp.float32)
    out2 = grad2g(None, pred2, max_block_rows=16)
    jax.block_until_ready(out2)
    ref2 = _reference(pred2)
    assert jnp.allclose(out2, ref2, rtol=1e-5, atol=1e-6), (float(out2), float(ref2))

    print("KERNEL_OK")
</pallas_src>

<mosaic_0001>
module attributes {stable_mosaic.version = 11 : i64} {
  func.func @_grad2g_block_kernel(%arg0: i32, %arg1: memref<8x256xf32, #tpu.memory_space<vmem>>, %arg2: memref<1x8x128xf32, #tpu.memory_space<vmem>>) attributes {dimension_semantics = [#tpu.dimension_semantics<parallel>], iteration_bounds = array<i64: 1>, scalar_prefetch = 0 : i64, scratch_operands = 0 : i64, tpu.core_type = #tpu.core_type<tc>, window_params = [{transform_indices = @transform_0, window_bounds = array<i64: 8, 256>}, {transform_indices = @transform_1, window_bounds = array<i64: 1, 8, 128>}]} {
    %c0 = arith.constant 0 : index
    %c0_0 = arith.constant 0 : index
    %0 = vector.load %arg1[%c0, %c0_0] : memref<8x256xf32, #tpu.memory_space<vmem>>, vector<8x256xf32>
    %c240_i32 = arith.constant 240 : i32
    %1 = tpu.dynamic_rotate %0 by %c240_i32 dim 1 : vector<8x256xf32>, i32 -> vector<8x256xf32>
    %c255_i32 = arith.constant 255 : i32
    %2 = tpu.dynamic_rotate %0 by %c255_i32 dim 1 : vector<8x256xf32>, i32 -> vector<8x256xf32>
    %c240_i32_1 = arith.constant 240 : i32
    %3 = tpu.dynamic_rotate %1 by %c240_i32_1 dim 1 : vector<8x256xf32>, i32 -> vector<8x256xf32>
    %c255_i32_2 = arith.constant 255 : i32
    %4 = tpu.dynamic_rotate %2 by %c255_i32_2 dim 1 : vector<8x256xf32>, i32 -> vector<8x256xf32>
    %c255_i32_3 = arith.constant 255 : i32
    %5 = tpu.dynamic_rotate %1 by %c255_i32_3 dim 1 : vector<8x256xf32>, i32 -> vector<8x256xf32>
    %6 = arith.subf %1, %0 : vector<8x256xf32>
    %7 = arith.subf %2, %0 : vector<8x256xf32>
    %8 = arith.subf %3, %1 : vector<8x256xf32>
    %9 = arith.subf %8, %6 : vector<8x256xf32>
    %10 = arith.subf %4, %2 : vector<8x256xf32>
    %11 = arith.subf %10, %7 : vector<8x256xf32>
    %12 = arith.subf %5, %1 : vector<8x256xf32>
    %13 = arith.subf %12, %7 : vector<8x256xf32>
    %14 = tpu.iota {dimensions = array<i32: 1>} : vector<1x256xi32>
    %c15_i32 = arith.constant 15 : i32
    %15 = vector.broadcast %c15_i32 : i32 to vector<1x256xi32>
    %16 = arith.andi %14, %15 : vector<1x256xi32>
    %c224_i32 = arith.constant 224 : i32
    %17 = vector.broadcast %c224_i32 : i32 to vector<1x256xi32>
    %18 = arith.cmpi slt, %14, %17 : vector<1x256xi32>
    %c14_i32 = arith.constant 14 : i32
    %19 = vector.broadcast %c14_i32 : i32 to vector<1x256xi32>
    %20 = arith.cmpi slt, %16, %19 : vector<1x256xi32>
    %c240_i32_4 = arith.constant 240 : i32
    %21 = vector.broadcast %c240_i32_4 : i32 to vector<1x256xi32>
    %22 = arith.cmpi slt, %14, %21 : vector<1x256xi32>
    %c15_i32_5 = arith.constant 15 : i32
    %23 = vector.broadcast %c15_i32_5 : i32 to vector<1x256xi32>
    %24 = arith.cmpi slt, %16, %23 : vector<1x256xi32>
    %25 = arith.andi %22, %24 : vector<1x256xi1>
    %cst = arith.constant 0.000000e+00 : f32
    %26 = vector.shape_cast %18 : vector<1x256xi1> to vector<1x256xi1>
    %27 = vector.broadcast %26 : vector<1x256xi1> to vector<8x256xi1>
    %28 = vector.broadcast %cst : f32 to vector<8x256xf32>
    %29 = arith.select %27, %9, %28 : vector<8x256xi1>, vector<8x256xf32>
    %30 = arith.mulf %29, %29 : vector<8x256xf32>
    %cst_6 = arith.constant 5.58035739E-4 : f32
    %31 = vector.broadcast %cst_6 : f32 to vector<8x256xf32>
    %32 = arith.mulf %30, %31 : vector<8x256xf32>
    %cst_7 = arith.constant 0.000000e+00 : f32
    %33 = vector.shape_cast %20 : vector<1x256xi1> to vector<1x256xi1>
    %34 = vector.broadcast %33 : vector<1x256xi1> to vector<8x256xi1>
    %35 = vector.broadcast %cst_7 : f32 to vector<8x256xf32>
    %36 = arith.select %34, %11, %35 : vector<8x256xi1>, vector<8x256xf32>
    %37 = arith.mulf %36, %36 : vector<8x256xf32>
    %cst_8 = arith.constant 5.58035739E-4 : f32
    %38 = vector.broadcast %cst_8 : f32 to vector<8x256xf32>
    %39 = arith.mulf %37, %38 : vector<8x256xf32>
    %40 = arith.addf %32, %39 : vector<8x256xf32>
    %cst_9 = arith.constant 0.000000e+00 : f32
    %41 = vector.shape_cast %25 : vector<1x256xi1> to vector<1x256xi1>
    %42 = vector.broadcast %41 : vector<1x256xi1> to vector<8x256xi1>
    %43 = vector.broadcast %cst_9 : f32 to vector<8x256xf32>
    %44 = arith.select %42, %13, %43 : vector<8x256xi1>, vector<8x256xf32>
    %45 = arith.mulf %44, %44 : vector<8x256xf32>
    %cst_10 = arith.constant 0.00111111114 : f32
    %46 = vector.broadcast %cst_10 : f32 to vector<8x256xf32>
    %47 = arith.mulf %45, %46 : vector<8x256xf32>
    %48 = arith.addf %40, %47 : vector<8x256xf32>
    %49 = vector.shape_cast %48 : vector<8x256xf32> to vector<1x8x256xf32>
    %cst_11 = arith.constant dense<0.000000e+00> : vector<1xf32>
    %50 = vector.multi_reduction <add>, %49, %cst_11 [1, 2] : vector<1x8x256xf32> to vector<1xf32>
    %51 = vector.shape_cast %50 : vector<1xf32> to vector<1x1x1xf32>
    %52 = vector.extract %51[0, 0, 0] : f32 from vector<1x1x1xf32>
    %53 = vector.broadcast %52 : f32 to vector<1x8x128xf32>
    %c0_12 = arith.constant 0 : index
    %c0_13 = arith.constant 0 : index
    %c0_14 = arith.constant 0 : index
    %54 = vector.load %arg2[%c0_12, %c0_13, %c0_14] : memref<1x8x128xf32, #tpu.memory_space<vmem>>, vector<1x8x128xf32>
    tpu.vector_store %arg2[%c0_12, %c0_13, %c0_14], %53 {strides = array<i32>} : memref<1x8x128xf32, #tpu.memory_space<vmem>>, vector<1x8x128xf32>,
    return
  }
  func.func @transform_0(%arg0: i32) -> (i32, i32) {
    %c0_i32 = arith.constant 0 : i32
    %c0_i32_0 = arith.constant 0 : i32
    return %arg0, %c0_i32 : i32, i32
  }
  func.func @transform_1(%arg0: i32) -> (i32, i32, i32) {
    %c0_i32 = arith.constant 0 : i32
    %c0_i32_0 = arith.constant 0 : i32
    %c0_i32_1 = arith.constant 0 : i32
    return %arg0, %c0_i32, %c0_i32_0 : i32, i32, i32
  }
}

</mosaic_0001>

<bundles_post_ra>
// kernel: tpu_custom_call.1
= control target key start
LH: loop header
LB: loop body
LE: loop exit
PB: predicated region body
PF: predicated region fallthrough
CT: control target
= control target key end

     0   :  { %6 = vsyncpa [#allocation3], 0  ;;  %s250_s0 = inlined_call_operand.hbm [shape: f32[8,256], index: 0, kind: input, shape index: {}]   ;;  %s251_s1 = inlined_call_operand.hbm [shape: f32[1,8,128], index: 1, kind: output, shape index: {}]  }
   0x1   :  { %7 = vsyncpa [#allocation4], 0  ;;  %s201_s6 = smov [#allocation2]   ;;  %s153_s10 = scalar_lea.hbm %s250_s0, 256 }
   0x2   :  { %s14_s7 = sshll.u32 %s201_s6, 4  ;;  %p154_p0 = scmp.ne.s32.totalorder %s250_s0, %s153_s10  ;;  %s15_s7 = int_to_ptr.vmem [resolvable:$true] %s14_s7 }
   0x3   :  { %p157_p1 = scmp.lt.u32.totalorder %s153_s10, %s250_s0 }
   0x5   :  { %p159_p2 = pnand %p157_p1, %p154_p0 }
   0x7   :  { %162 = shalt.err (!%p159_p2)
}
   0x8   :  { %s163_s15 = scalar_lea.vmem %s15_s7, 256  ;;  %p168_p4 = scmp.lt.s32.totalorder %s15_s7, %s15_s7 }
   0x9   :  { %p164_p3 = scmp.ne.s32.totalorder %s15_s7, %s163_s15  ;;  %p169_p5 = scmp.lt.s32.totalorder %s163_s15, %s163_s15 }
   0xb   :  { %p170_p6 = por %p169_p5, %p168_p4 }
   0xd   :  { %p171_p7 = pnand %p170_p6, %p164_p3 }
   0xf   :  { %174 = shalt.err (!%p171_p7)
}
  0x10   :  { %17 = dma.hbm_to_vmem [thread:$0]  %s250_s0, 256, %s15_s7, [#allocation3]  }
  0x11   :  { %197 = dma.done.wait [#allocation3], 256  }
  0x12   :  { %198 = vsyncadd [#allocation3], 4294967040  ;;  %v21_v0 = vld [vmem:[#allocation2] sm:$0xff]  ;;  %s202_s18 = smov 127   ;;  %s203_s19 = smov 112   ;;  %v22_v1 = vld [vmem:[#allocation2 + $0x8] sm:$0xff]  ;;  %v27_v2 = vlaneseq }
  0x13   :  { %32 = vrot.lane.b32.xlu1 %v21_v0, %s202_s18  ;;  %23 = vrot.lane.b32.xlu0 %v21_v0, %s203_s19  ;;  %s204_s0 = smov [#allocation5]  }
  0x14   :  { %v28_v3 = vand.u32 127, %v27_v2  ;;  %s138_s20 = sshll.u32 %s204_s0, 4  ;;  %s139_s20 = int_to_ptr.vmem [resolvable:$true] %s138_s20 }
  0x15   :  { %s175_s22 = scalar_lea.vmem %s139_s20, 128  ;;  %p180_p9 = scmp.lt.s32.totalorder %s139_s20, %s139_s20 }
  0x16   :  { %vm29_vm0 = vcmp.lt.s32.totalorder %v28_v3, 112  ;;  %vm36_vm1 = vcmp.lt.s32.totalorder %v28_v3, 127  ;;  %v73_v14 = vadd.s32 128, %v28_v3  ;;  %v74_v20 = vand.u32 15, %v28_v3  ;;  %p176_p8 = scmp.ne.s32.totalorder %s139_s20, %s175_s22  ;;  %p181_p10 = scmp.lt.s32.totalorder %s175_s22, %s175_s22 }
  0x17   :  { %34 = vrot.lane.b32.xlu1 %v22_v1, %s202_s18  ;;  %25 = vrot.lane.b32.xlu0 %v22_v1, %s203_s19 }
  0x18   :  { %v75_v21 = vand.u32 15, %v73_v14  ;;  %vm77_vm2 = vcmp.lt.s32.totalorder %v73_v14, 224  ;;  %vm78_vm3 = vcmp.lt.s32.totalorder %v74_v20, 14  ;;  %vm81_vm5 = vcmp.lt.s32.totalorder %v73_v14, 240  ;;  %p182_p11 = por %p181_p10, %p180_p9 }
  0x19   :  { %vm82_vm7 = vcmp.lt.s32.totalorder %v74_v20, 15 }
  0x1a   :  { %vm79_vm4 = vcmp.lt.s32.totalorder %v75_v21, 14  ;;  %vm83_vm6 = vcmp.lt.s32.totalorder %v75_v21, 15  ;;  %p183_p12 = pnand %p182_p11, %p176_p8 }
  0x1b   :  { %vm85_vm8 = vmand %vm81_vm5, %vm83_vm6 }
  0x85   :  { %v33_v4 = vpop.permute.xlu1 %32  ;;  %v24_v5 = vpop.permute.xlu0 %23 }
  0x89   :  { %v26_v6 = vpop.permute.xlu0 %25  ;;  %v35_v9 = vpop.permute.xlu1 %34 }
  0x8a   :  { %v30_v7 = vsel %vm29_vm0, %v24_v5, %v26_v6  ;;  %v31_v8 = vsel %vm29_vm0, %v26_v6, %v24_v5  ;;  %v38_v10 = vsel %vm36_vm1, %v35_v9, %v33_v4  ;;  %v37_v11 = vsel %vm36_vm1, %v33_v4, %v35_v9 }
  0x8b   :  { %41 = vrot.lane.b32.xlu1 %v31_v8, %s203_s19  ;;  %39 = vrot.lane.b32.xlu0 %v30_v7, %s203_s19  ;;  %v58_v17 = vsub.f32 %v31_v8, %v22_v1  ;;  %v57_v25 = vsub.f32 %v30_v7, %v21_v0  ;;  %v60_v28 = vsub.f32 %v38_v10, %v22_v1 }
  0x8c   :  { %v59_v29 = vsub.f32 %v37_v11, %v21_v0 }
  0x8f   :  { %47 = vrot.lane.b32.xlu1 %v38_v10, %s202_s18  ;;  %45 = vrot.lane.b32.xlu0 %v37_v11, %s202_s18 }
  0x93   :  { %53 = vrot.lane.b32.xlu1 %v31_v8, %s202_s18  ;;  %51 = vrot.lane.b32.xlu0 %v30_v7, %s202_s18 }
  0xfd   :  { %v42_v12 = vpop.permute.xlu1 %41  ;;  %v40_v13 = vpop.permute.xlu0 %39 }
  0xfe   :  { %v43_v15 = vsel %vm29_vm0, %v40_v13, %v42_v12  ;;  %v44_v16 = vsel %vm29_vm0, %v42_v12, %v40_v13 }
  0xff   :  { %v62_v18 = vsub.f32 %v44_v16, %v31_v8  ;;  %v61_v19 = vsub.f32 %v43_v15, %v30_v7 }
 0x101   :  { %v64_v22 = vsub.f32 %v62_v18, %v58_v17  ;;  %v48_v23 = vpop.permute.xlu1 %47  ;;  %v46_v24 = vpop.permute.xlu0 %45  ;;  %v63_v32 = vsub.f32 %v61_v19, %v57_v25 }
 0x102   :  { %v49_v26 = vsel %vm36_vm1, %v46_v24, %v48_v23  ;;  %v50_v27 = vsel %vm36_vm1, %v48_v23, %v46_v24 }
 0x103   :  { %v65_v30 = vsub.f32 %v49_v26, %v37_v11  ;;  %v66_v31 = vsub.f32 %v50_v27, %v38_v10  ;;  %v91_v33 = vsel %vm77_vm2, %v64_v22, 0.0  ;;  %v92_v44 = vmul.f32 %v63_v32, %v63_v32 }
 0x104   :  { %v93_v45 = vmul.f32 %v91_v33, %v91_v33 }
 0x105   :  { %v67_v34 = vsub.f32 %v65_v30, %v59_v29  ;;  %v68_v35 = vsub.f32 %v66_v31, %v60_v28  ;;  %v54_v36 = vpop.permute.xlu1 %53  ;;  %v52_v37 = vpop.permute.xlu0 %51  ;;  %v94_v54 = vmul.f32 0.00055803574, %v92_v44 }
 0x106   :  { %v55_v38 = vsel %vm36_vm1, %v52_v37, %v54_v36  ;;  %v56_v39 = vsel %vm36_vm1, %v54_v36, %v52_v37  ;;  %v95_v55 = vmul.f32 0.00055803574, %v93_v45 }
 0x107   :  { %v100_v40 = vsel %vm78_vm3, %v67_v34, 0.0  ;;  %v101_v41 = vsel %vm79_vm4, %v68_v35, 0.0  ;;  %v69_v42 = vsub.f32 %v55_v38, %v30_v7  ;;  %v70_v43 = vsub.f32 %v56_v39, %v31_v8 }
 0x108   :  { %v102_v46 = vmul.f32 %v100_v40, %v100_v40  ;;  %v103_v47 = vmul.f32 %v101_v41, %v101_v41 }
 0x109   :  { %v71_v48 = vsub.f32 %v69_v42, %v59_v29  ;;  %v72_v49 = vsub.f32 %v70_v43, %v60_v28 }
 0x10a   :  { %v104_v50 = vmul.f32 0.00055803574, %v102_v46  ;;  %v105_v51 = vmul.f32 0.00055803574, %v103_v47 }
 0x10b   :  { %v112_v52 = vsel %vm82_vm7, %v71_v48, 0.0  ;;  %v113_v53 = vsel %vm85_vm8, %v72_v49, 0.0 }
 0x10c   :  { %v114_v56 = vmul.f32 %v112_v52, %v112_v52  ;;  %v115_v57 = vmul.f32 %v113_v53, %v113_v53  ;;  %v106_v58 = vadd.f32 %v104_v50, %v94_v54  ;;  %v107_v59 = vadd.f32 %v105_v51, %v95_v55 }
 0x10e   :  { %v116_v60 = vmul.f32 0.0011111111, %v114_v56  ;;  %v117_v61 = vmul.f32 0.0011111111, %v115_v57 }
 0x110   :  { %v118_v62 = vadd.f32 %v116_v60, %v106_v58  ;;  %v119_v63 = vadd.f32 %v117_v61, %v107_v59 }
 0x112   :  { %v120_v0 = vadd.f32 %v119_v63, %v118_v62 }
 0x114   :  { %121 = vadd.xlane.f32.xlu0 %v120_v0 }
 0x1a1   :  { %v122_v1 = vpop.xlane.xlu0 %121 }
 0x1a2   :  { %v123_v2 = vrot.slane %v122_v1, 4 }
 0x1a4   :  { %v124_v3 = vadd.f32 %v123_v2, %v122_v1 }
 0x1a6   :  { %v125_v4 = vrot.slane %v124_v3, 2 }
 0x1a8   :  { %v126_v5 = vadd.f32 %v125_v4, %v124_v3 }
 0x1aa   :  { %v127_v6 = vrot.slane %v126_v5, 1 }
 0x1ac   :  { %v128_v7 = vadd.f32 %v127_v6, %v126_v5 }
 0x1ae   :  { %147 = vpush %v128_v7 }
 0x1df   :  { %s148_s21 = spop %147 }
 0x1e0   :  { %v130_v8 = vstv %s148_s21 }
 0x1e1   :  { %131 = vst [vmem:[#allocation5] sm:$0xff] %v130_v8 }
 0x1e2   :  { %186 = shalt.err (!%p183_p12)
}
 0x1e3   :  { %s187_s25 = scalar_lea.hbm %s251_s1, 128 }
 0x1e4   :  { %p188_p13 = scmp.ne.s32.totalorder %s251_s1, %s187_s25  ;;  %p191_p0 = scmp.lt.u32.totalorder %s187_s25, %s251_s1 }
 0x1e6   :  { %p193_p1 = pnand %p191_p0, %p188_p13 }
 0x1e8   :  { %196 = shalt.err (!%p193_p1)
}
 0x1e9   :  { %141 = dma.vmem_to_hbm [thread:$0]  %s139_s20, 128, %s251_s1, [#allocation4]  }
 0x1ea   :  { %199 = dma.done.wait [#allocation4], 128  }
 0x1eb   :  { %200 = vsyncadd [#allocation4], 4294967168 }
 0x1ec   :  { %145 = vsyncpa [#allocation3], 1 }
 0x1ed   :  { %146 = vsyncpa [#allocation4], 1 }

</bundles_post_ra>
